<compile_context>
chip_gen: v5e
topology: v5e:2x2
jax: 0.10.0
libtpu: 0.0.40
codegen_flags: <defaults>
</compile_context>

<pallas_src>
import functools

import numpy as np
import jax
import jax.numpy as jnp
from jax.experimental import pallas as pl
from jax.experimental.pallas import tpu as pltpu

POOL_SIZES = (1, 2, 3, 6)
EPS = 1e-5
_SS = sum(s * s for s in POOL_SIZES)        # 50 pooled "pixels" total
_SS_P = 64                                  # padded to a sublane-friendly size


# ----------------------------------------------------------------------------
# Host-side helpers: tiny per-axis resampling matrices encoding PyTorch math.
# ----------------------------------------------------------------------------
def _adaptive_pool_matrix(out_size, in_size):
    """Per-axis averaging matrix matching nn.AdaptiveAvgPool2d."""
    m = np.zeros((out_size, in_size), dtype=np.float32)
    for i in range(out_size):
        start = (i * in_size) // out_size
        end = -((-(i + 1) * in_size) // out_size)   # ceil((i+1)*in/out)
        m[i, start:end] = 1.0 / float(end - start)
    return m


def _bilinear_matrix(out_size, in_size):
    """Per-axis matrix for F.interpolate(mode='bilinear', align_corners=True)."""
    m = np.zeros((out_size, in_size), dtype=np.float32)
    if in_size == 1:
        m[:, 0] = 1.0
        return m
    scale = (in_size - 1) / (out_size - 1) if out_size > 1 else 0.0
    for d in range(out_size):
        src = d * scale
        i0 = min(int(np.floor(src)), in_size - 1)
        i1 = min(i0 + 1, in_size - 1)
        frac = src - i0
        m[d, i0] += 1.0 - frac
        m[d, i1] += frac
    return m


def _bn_fold(gamma, beta, mean, var):
    scale = gamma / jnp.sqrt(var + EPS)
    shift = beta - mean * scale
    return scale, shift


def _round_up(x, m):
    return ((x + m - 1) // m) * m


def _vmem_capacity_bytes():
    """Physical VMEM of the current chip; conservative fallback (v7x = 64 MiB)."""
    try:
        return int(pltpu.get_tpu_info().vmem_capacity_bytes)
    except Exception:
        return 64 * 1024 * 1024


def _const_spec(shape):
    """BlockSpec for a grid-invariant operand; single-buffered when supported."""
    zeros = (0,) * len(shape)
    idx = lambda i, j: zeros
    try:
        return pl.BlockSpec(shape, idx, pipeline_mode=pl.Buffered(1))
    except Exception:  # older JAX without pipeline_mode / Buffered
        return pl.BlockSpec(shape, idx)


def _pick_hw_tile(hw, cin, cout_p, ss_p, cstage, budget, target):
    """Largest multiple-of-128 HW tile whose blocks fit the VMEM budget."""
    # bytes per HW row, double-buffered bf16 operands; max of the two kernels
    k1_row = 2 * 2 * (cin + ss_p + cout_p)       # x, Kall, P tiles
    k2_row = 2 * 2 * (cout_p + ss_p + cout_p)    # P, Ball, out tiles
    per_row = max(k1_row, k2_row)
    # operands resident across the grid (weights, Z, accumulators)
    resident = (2 * (cin * cstage + cstage * cout_p + cin * cout_p)   # bf16 weights
                + 4 * (ss_p * cstage + cstage + cout_p)               # mask/bias/shift
                + 2 * 2 * ss_p * cout_p                               # Z
                + 4 * ss_p * cin)                                     # pooled_acc
    avail = max(budget - resident, per_row * 128)
    tile = min(target, avail // per_row)
    tile = max(128, (tile // 128) * 128)
    tile = min(tile, _round_up(hw, 128))
    return int(tile)


# ----------------------------------------------------------------------------
# Kernel 1: pooled stages + partial final conv, grid = (N, HW tiles).
#   x_ref     : (1, hw_tile, Cin)     bf16
#   kall_ref  : (SS_p, hw_tile)       bf16   stacked adaptive-pool matrices
#   wx_ref    : (Cin, Cout_p)         bf16   x-rows of the final conv (BN folded)
#   wcat_ref  : (Cin, 4*C4)           bf16   concatenated stage convs (BN folded)
#   bias_ref  : (1, 4*C4)             f32    concatenated stage BN shifts
#   mask_ref  : (SS_p, 4*C4)          f32    row-to-stage block mask
#   wproj_ref : (4*C4, Cout_p)        bf16   stage rows of the final conv
#   p_ref     : (1, hw_tile, Cout_p)  bf16   P = x_tile @ Wx
#   z_ref     : (1, SS_p, Cout_p)     bf16   Z = blockmask(relu(.)) @ Wproj
#   pooled_acc: (SS_p, Cin)           f32    VMEM scratch, accumulated over HW
# ----------------------------------------------------------------------------
def _stage_kernel(x_ref, kall_ref, wx_ref, wcat_ref, bias_ref, mask_ref,
                  wproj_ref, p_ref, z_ref, pooled_acc):
    j = pl.program_id(1)

    @pl.when(j == 0)
    def _():
        pooled_acc[...] = jnp.zeros_like(pooled_acc)

    x = x_ref[0]                                               # (hw_tile, Cin)
    # accumulate stacked adaptive-average-pool sums over HW tiles
    pooled_acc[...] += jnp.dot(kall_ref[...], x,
                               preferred_element_type=jnp.float32)
    # per-tile partial of the final 1x1 conv over the x-channel rows
    p_ref[0] = jnp.dot(x, wx_ref[...],
                       preferred_element_type=jnp.float32).astype(p_ref.dtype)

    @pl.when(j == pl.num_programs(1) - 1)
    def _():
        pooled = pooled_acc[...].astype(jnp.bfloat16)          # (SS_p, Cin)
        y = jnp.dot(pooled, wcat_ref[...],
                    preferred_element_type=jnp.float32)        # (SS_p, 4*C4)
        y = jnp.maximum(y + bias_ref[...], 0.0) * mask_ref[...]
        z = jnp.dot(y.astype(jnp.bfloat16), wproj_ref[...],
                    preferred_element_type=jnp.float32)        # (SS_p, Cout_p)
        z_ref[0] = z.astype(z_ref.dtype)


# ----------------------------------------------------------------------------
# Kernel 2: out = relu(P + B_all @ Z + shift), grid = (N, HW tiles).
#   p_ref     : (1, hw_tile, Cout_p)  bf16
#   z_ref     : (1, SS_p, Cout_p)     bf16
#   b_ref     : (hw_tile, SS_p)       bf16   concatenated bilinear matrices
#   shift_ref : (1, Cout_p)           f32
#   o_ref     : (1, hw_tile, Cout_p)  bf16
# ----------------------------------------------------------------------------
def _fuse_kernel(p_ref, z_ref, b_ref, shift_ref, o_ref):
    acc = p_ref[0].astype(jnp.float32)
    acc = acc + jnp.dot(b_ref[...], z_ref[0],
                        preferred_element_type=jnp.float32)
    o_ref[0] = jnp.maximum(acc + shift_ref[...], 0.0).astype(o_ref.dtype)


# ----------------------------------------------------------------------------
# Wrapper: NCHW in -> NCHW out
# ----------------------------------------------------------------------------
@functools.partial(jax.jit, static_argnames=("hw_tile",))
def pyramid_pooling_forward(x_nchw, params, hw_tile=None):
    n, cin, h, w = x_nchw.shape
    hw = h * w
    s_count = len(POOL_SIZES)
    cout = params["final_w"].shape[1]
    c4 = cout // 4
    cstage = s_count * c4
    ss, ss_p = _SS, _SS_P
    cout_p = _round_up(cout, 128)            # no-op slice when already aligned

    # --- VMEM-aware tiling (v7x: 64 MiB, v5e/v6e: 128 MiB).
    vmem_cap = _vmem_capacity_bytes()
    budget = int(vmem_cap * 0.75)
    target = 1024 if vmem_cap >= 96 * 1024 * 1024 else 512
    if hw_tile is None:
        hw_tile = _pick_hw_tile(hw, cin, cout_p, ss_p, cstage, budget, target)
    hw_p = _round_up(hw, hw_tile)            # pad HW (handles e.g. 60x60 maps)
    n_hw = hw_p // hw_tile

    # --- NCHW -> (N, HW, C), zero-pad HW, bf16 cast fused with the transpose.
    x = jnp.transpose(x_nchw, (0, 2, 3, 1)).reshape(n, hw, cin).astype(jnp.bfloat16)
    if hw_p != hw:
        x = jnp.pad(x, ((0, 0), (0, hw_p - hw), (0, 0)))
    # TODO(synk): if the surrounding model consumes NHWC, drop both wrapper
    # transposes entirely (they are full HBM read+writes of x / out).

    # --- trace-time constants: stacked pooling / bilinear matrices, block mask.
    k_blocks, b_blocks = [], []
    mask_np = np.zeros((ss_p, cstage), np.float32)
    row = 0
    for k, s in enumerate(POOL_SIZES):
        k_blocks.append(np.kron(_adaptive_pool_matrix(s, h),
                                _adaptive_pool_matrix(s, w)))
        b_blocks.append(np.kron(_bilinear_matrix(h, s),
                                _bilinear_matrix(w, s)))
        mask_np[row:row + s * s, k * c4:(k + 1) * c4] = 1.0
        row += s * s
    kall_np = np.zeros((ss_p, hw_p), np.float32)
    kall_np[:ss, :hw] = np.concatenate(k_blocks, axis=0)
    ball_np = np.zeros((hw_p, ss_p), np.float32)
    ball_np[:hw, :ss] = np.concatenate(b_blocks, axis=1)
    kall = jnp.asarray(kall_np, dtype=jnp.bfloat16)            # (SS_p, HW_p)
    ball = jnp.asarray(ball_np, dtype=jnp.bfloat16)            # (HW_p, SS_p)
    mask = jnp.asarray(mask_np)                                # (SS_p, 4*C4)

    # --- fold BatchNorms into conv weights; pad output channels to lane width.
    fscale, fshift = _bn_fold(*params["final_bn"])
    wf = params["final_w"].astype(jnp.float32) * fscale[None, :]
    if cout_p != cout:
        wf = jnp.pad(wf, ((0, 0), (0, cout_p - cout)))
        fshift = jnp.pad(fshift, (0, cout_p - cout))
    wx = wf[:cin].astype(jnp.bfloat16)                         # (Cin, Cout_p)
    wproj = wf[cin:].astype(jnp.bfloat16)                      # (4*C4, Cout_p)
    fshift_p = fshift.reshape(1, cout_p).astype(jnp.float32)

    wcat_l, bias_l = [], []
    for k in range(s_count):
        sc, sh = _bn_fold(*params["stage_bn"][k])
        wcat_l.append(params["stage_w"][k].astype(jnp.float32) * sc[None, :])
        bias_l.append(sh)
    wcat = jnp.concatenate(wcat_l, axis=1).astype(jnp.bfloat16)         # (Cin, 4*C4)
    bias = jnp.concatenate(bias_l).reshape(1, cstage).astype(jnp.float32)

    # --- Kernel 1: pooled stages -> Z, and P = x @ Wx (single read of x).
    # TODO(synk): at N=1 on v7x, additionally split the HW reduction across the
    # two TensorCores (per-core pooled partials + tiny combine) for ~2x here.
    p_all, z_all = pl.pallas_call(
        _stage_kernel,
        out_shape=(jax.ShapeDtypeStruct((n, hw_p, cout_p), jnp.bfloat16),
                   jax.ShapeDtypeStruct((n, ss_p, cout_p), jnp.bfloat16)),
        grid_spec=pltpu.PrefetchScalarGridSpec(
            num_scalar_prefetch=0,
            grid=(n, n_hw),
            in_specs=[
                pl.BlockSpec((1, hw_tile, cin), lambda i, j: (i, j, 0)),
                pl.BlockSpec((ss_p, hw_tile), lambda i, j: (0, j)),
                _const_spec((cin, cout_p)),       # wx
                _const_spec((cin, cstage)),       # wcat
                _const_spec((1, cstage)),         # bias
                _const_spec((ss_p, cstage)),      # mask
                _const_spec((cstage, cout_p)),    # wproj
            ],
            out_specs=[
                pl.BlockSpec((1, hw_tile, cout_p), lambda i, j: (i, j, 0)),
                pl.BlockSpec((1, ss_p, cout_p), lambda i, j: (i, 0, 0)),
            ],
            scratch_shapes=[pltpu.VMEM((ss_p, cin), jnp.float32)],
        ),
        compiler_params=pltpu.CompilerParams(
            dimension_semantics=("parallel", "arbitrary"),
            vmem_limit_bytes=budget),
    )(x, kall, wx, wcat, bias, mask, wproj)

    # --- Kernel 2: out = relu(P + B_all @ Z + shift), bf16 writeback.
    out_flat = pl.pallas_call(
        _fuse_kernel,
        out_shape=jax.ShapeDtypeStruct((n, hw_p, cout_p), jnp.bfloat16),
        grid_spec=pltpu.PrefetchScalarGridSpec(
            num_scalar_prefetch=0,
            grid=(n, n_hw),
            in_specs=[
                pl.BlockSpec((1, hw_tile, cout_p), lambda i, j: (i, j, 0)),
                pl.BlockSpec((1, ss_p, cout_p), lambda i, j: (i, 0, 0)),
                pl.BlockSpec((hw_tile, ss_p), lambda i, j: (j, 0)),
                _const_spec((1, cout_p)),
            ],
            out_specs=pl.BlockSpec((1, hw_tile, cout_p), lambda i, j: (i, j, 0)),
        ),
        compiler_params=pltpu.CompilerParams(
            dimension_semantics=("parallel", "parallel"),
            vmem_limit_bytes=budget),
    )(p_all, z_all, ball, fshift_p)

    out = out_flat[:, :hw, :cout].astype(x_nchw.dtype).reshape(n, h, w, cout)
    # Dropout2d(p=0.3) is identity in eval mode.
    # TODO(synk): training-mode channel dropout / batch-statistic BN not implemented.
    return jnp.transpose(out, (0, 3, 1, 2))  # back to NCHW


# ----------------------------------------------------------------------------
# Pure-JAX reference (f32, no Pallas) for validation.
# ----------------------------------------------------------------------------
def reference_forward(x_nchw, params):
    n, cin, h, w = x_nchw.shape
    x = jnp.transpose(x_nchw, (0, 2, 3, 1)).astype(jnp.float32)  # NHWC
    feats = [x]
    for idx, s in enumerate(POOL_SIZES):
        pr = jnp.asarray(_adaptive_pool_matrix(s, h))
        pc = jnp.asarray(_adaptive_pool_matrix(s, w))
        pooled = jnp.einsum("ih,jw,nhwc->nijc", pr, pc, x)
        conv = jnp.einsum("nijc,cd->nijd", pooled, params["stage_w"][idx])
        scale, shift = _bn_fold(*params["stage_bn"][idx])
        y = jnp.maximum(conv * scale + shift, 0.0)
        rr = jnp.asarray(_bilinear_matrix(h, s))
        rc = jnp.asarray(_bilinear_matrix(w, s))
        feats.append(jnp.einsum("hi,wj,nijd->nhwd", rr, rc, y))
    cat = jnp.concatenate(feats, axis=-1)
    conv = jnp.einsum("nhwc,cd->nhwd", cat, params["final_w"])
    scale, shift = _bn_fold(*params["final_bn"])
    out = jnp.maximum(conv * scale + shift, 0.0)
    return jnp.transpose(out, (0, 3, 1, 2))


def _make_params(key, cin, cout):
    c4 = cout // 4
    s = len(POOL_SIZES)
    ctot = cin + s * c4
    keys = jax.random.split(key, 3 + 2 * s)
    stage_w = [0.1 * jax.random.normal(keys[1 + i], (cin, c4), jnp.float32)
               for i in range(s)]
    stage_bn = []
    for i in range(s):
        k1, k2, k3, k4 = jax.random.split(keys[1 + s + i], 4)
        gamma = 1.0 + 0.1 * jax.random.normal(k1, (c4,), jnp.float32)
        beta = 0.1 * jax.random.normal(k2, (c4,), jnp.float32)
        mean = 0.1 * jax.random.normal(k3, (c4,), jnp.float32)
        var = jnp.abs(jax.random.normal(k4, (c4,), jnp.float32)) + 0.5
        stage_bn.append((gamma, beta, mean, var))
    kf1, kf2, kf3, kf4, kf5 = jax.random.split(keys[1 + 2 * s], 5)
    final_w = 0.1 * jax.random.normal(kf1, (ctot, cout), jnp.float32)
    final_bn = (1.0 + 0.1 * jax.random.normal(kf2, (cout,), jnp.float32),
                0.1 * jax.random.normal(kf3, (cout,), jnp.float32),
                0.1 * jax.random.normal(kf4, (cout,), jnp.float32),
                jnp.abs(jax.random.normal(kf5, (cout,), jnp.float32)) + 0.5)
    return {"stage_w": stage_w, "stage_bn": stage_bn,
            "final_w": final_w, "final_bn": final_bn}


# ----------------------------------------------------------------------------
if __name__ == "__main__":
    key = jax.random.PRNGKey(0)
    kx1, kx2, kp = jax.random.split(key, 3)

    N, Cin, Cout = 2, 8, 16
    params = _make_params(kp, Cin, Cout)

    # Test 1: 16x16 map, hw_tile=128 -> 2 HW tiles per batch element:
    # exercises the tiled pooled-sum accumulation and per-tile P writes.
    x1 = jax.random.normal(kx1, (N, Cin, 16, 16), jnp.float32)
    out1 = jax.block_until_ready(pyramid_pooling_forward(x1, params, hw_tile=128))
    assert out1.shape == (N, Cout, 16, 16), out1.shape
    ref1 = jax.block_until_ready(reference_forward(x1, params))
    np.testing.assert_allclose(np.asarray(out1), np.asarray(ref1),
                               rtol=2e-2, atol=2e-2)

    # Test 2: 15x15 map (hw=225, not a multiple of 128) -> exercises the
    # zero-padded ragged-HW path with a partially padded last tile.
    x2 = jax.random.normal(kx2, (N, Cin, 15, 15), jnp.float32)
    out2 = jax.block_until_ready(pyramid_pooling_forward(x2, params, hw_tile=128))
    assert out2.shape == (N, Cout, 15, 15), out2.shape
    ref2 = jax.block_until_ready(reference_forward(x2, params))
    np.testing.assert_allclose(np.asarray(out2), np.asarray(ref2),
                               rtol=2e-2, atol=2e-2)

    print("KERNEL_OK")
</pallas_src>

<mosaic_0001>
module attributes {stable_mosaic.version = 11 : i64} {
  func.func @_stage_kernel(%arg0: i32, %arg1: i32, %arg2: memref<1x128x8xbf16, #tpu.memory_space<vmem>>, %arg3: memref<64x128xbf16, #tpu.memory_space<vmem>>, %arg4: memref<8x128xbf16, #tpu.memory_space<vmem>>, %arg5: memref<8x16xbf16, #tpu.memory_space<vmem>>, %arg6: memref<1x16xf32, #tpu.memory_space<vmem>>, %arg7: memref<64x16xf32, #tpu.memory_space<vmem>>, %arg8: memref<16x128xbf16, #tpu.memory_space<vmem>>, %arg9: memref<1x128x128xbf16, #tpu.memory_space<vmem>>, %arg10: memref<1x64x128xbf16, #tpu.memory_space<vmem>>, %arg11: memref<64x8xf32, #tpu.memory_space<vmem>>) attributes {dimension_semantics = [#tpu.dimension_semantics<parallel>, #tpu.dimension_semantics<arbitrary>], iteration_bounds = array<i64: 2, 2>, scalar_prefetch = 0 : i64, scratch_operands = 1 : i64, tpu.core_type = #tpu.core_type<tc>, window_params = [{transform_indices = @transform_0, window_bounds = array<i64: 1, 128, 8>}, {transform_indices = @transform_1, window_bounds = array<i64: 64, 128>}, {pipeline_mode = #tpu.pipeline_mode<synchronous>, transform_indices = @transform_2, window_bounds = array<i64: 8, 128>}, {pipeline_mode = #tpu.pipeline_mode<synchronous>, transform_indices = @transform_3, window_bounds = array<i64: 8, 16>}, {pipeline_mode = #tpu.pipeline_mode<synchronous>, transform_indices = @transform_4, window_bounds = array<i64: 1, 16>}, {pipeline_mode = #tpu.pipeline_mode<synchronous>, transform_indices = @transform_5, window_bounds = array<i64: 64, 16>}, {pipeline_mode = #tpu.pipeline_mode<synchronous>, transform_indices = @transform_6, window_bounds = array<i64: 16, 128>}, {transform_indices = @transform_7, window_bounds = array<i64: 1, 128, 128>}, {transform_indices = @transform_8, window_bounds = array<i64: 1, 64, 128>}]} {
    %c0_i32 = arith.constant 0 : i32
    %0 = arith.cmpi eq, %arg1, %c0_i32 : i32
    %1 = arith.extui %0 : i1 to i32
    %c0_i32_0 = arith.constant 0 : i32
    %2 = arith.cmpi ne, %1, %c0_i32_0 : i32
    scf.if %2 {
      %cst_16 = arith.constant 0.000000e+00 : f32
      %19 = vector.broadcast %cst_16 : f32 to vector<64x8xf32>
      %c0_17 = arith.constant 0 : index
      %c0_18 = arith.constant 0 : index
      %20 = vector.load %arg11[%c0_17, %c0_18] : memref<64x8xf32, #tpu.memory_space<vmem>>, vector<64x8xf32>
      tpu.vector_store %arg11[%c0_17, %c0_18], %19 {strides = array<i32>} : memref<64x8xf32, #tpu.memory_space<vmem>>, vector<64x8xf32>,
    } else {
    }
    %c0 = arith.constant 0 : index
    %c0_1 = arith.constant 0 : index
    %c0_2 = arith.constant 0 : index
    %3 = vector.load %arg2[%c0, %c0_1, %c0_2] : memref<1x128x8xbf16, #tpu.memory_space<vmem>>, vector<1x128x8xbf16>
    %4 = vector.shape_cast %3 : vector<1x128x8xbf16> to vector<128x8xbf16>
    %c0_3 = arith.constant 0 : index
    %c0_4 = arith.constant 0 : index
    %5 = vector.load %arg11[%c0_3, %c0_4] : memref<64x8xf32, #tpu.memory_space<vmem>>, vector<64x8xf32>
    %c0_5 = arith.constant 0 : index
    %c0_6 = arith.constant 0 : index
    %6 = vector.load %arg3[%c0_5, %c0_6] : memref<64x128xbf16, #tpu.memory_space<vmem>>, vector<64x128xbf16>
    %cst = arith.constant dense<0.000000e+00> : vector<64x8xf32>
    %7 = tpu.matmul %6, %4, %cst {dimension_numbers = #tpu.dot_dimension_numbers<[1], [0], [0], [1], [0, 0, 1, 1], [], []>} : vector<64x128xbf16>, vector<128x8xbf16>, vector<64x8xf32> -> vector<64x8xf32>
    %8 = arith.addf %5, %7 : vector<64x8xf32>
    %c0_7 = arith.constant 0 : index
    %c0_8 = arith.constant 0 : index
    %9 = vector.load %arg11[%c0_7, %c0_8] : memref<64x8xf32, #tpu.memory_space<vmem>>, vector<64x8xf32>
    tpu.vector_store %arg11[%c0_7, %c0_8], %8 {strides = array<i32>} : memref<64x8xf32, #tpu.memory_space<vmem>>, vector<64x8xf32>,
    %c0_9 = arith.constant 0 : index
    %c0_10 = arith.constant 0 : index
    %10 = vector.load %arg4[%c0_9, %c0_10] : memref<8x128xbf16, #tpu.memory_space<vmem>>, vector<8x128xbf16>
    %cst_11 = arith.constant dense<0.000000e+00> : vector<128x128xf32>
    %11 = tpu.matmul %4, %10, %cst_11 {dimension_numbers = #tpu.dot_dimension_numbers<[1], [0], [0], [1], [0, 0, 1, 1], [], []>} : vector<128x8xbf16>, vector<8x128xbf16>, vector<128x128xf32> -> vector<128x128xf32>
    %12 = arith.truncf %11 : vector<128x128xf32> to vector<128x128xbf16>
    %c0_12 = arith.constant 0 : index
    %c0_13 = arith.constant 0 : index
    %c0_14 = arith.constant 0 : index
    %13 = vector.load %arg9[%c0_12, %c0_13, %c0_14] : memref<1x128x128xbf16, #tpu.memory_space<vmem>>, vector<1x128x128xbf16>
    %14 = vector.shape_cast %13 : vector<1x128x128xbf16> to vector<128x128xbf16>
    %15 = vector.shape_cast %12 : vector<128x128xbf16> to vector<1x128x128xbf16>
    tpu.vector_store %arg9[%c0_12, %c0_13, %c0_14], %15 {strides = array<i32>} : memref<1x128x128xbf16, #tpu.memory_space<vmem>>, vector<1x128x128xbf16>,
    %c1_i32 = arith.constant 1 : i32
    %16 = arith.cmpi eq, %arg1, %c1_i32 : i32
    %17 = arith.extui %16 : i1 to i32
    %c0_i32_15 = arith.constant 0 : i32
    %18 = arith.cmpi ne, %17, %c0_i32_15 : i32
    scf.if %18 {
      %c0_16 = arith.constant 0 : index
      %c0_17 = arith.constant 0 : index
      %19 = vector.load %arg11[%c0_16, %c0_17] : memref<64x8xf32, #tpu.memory_space<vmem>>, vector<64x8xf32>
      %20 = arith.truncf %19 : vector<64x8xf32> to vector<64x8xbf16>
      %c0_18 = arith.constant 0 : index
      %c0_19 = arith.constant 0 : index
      %21 = vector.load %arg5[%c0_18, %c0_19] : memref<8x16xbf16, #tpu.memory_space<vmem>>, vector<8x16xbf16>
      %cst_20 = arith.constant dense<0.000000e+00> : vector<64x16xf32>
      %22 = tpu.matmul %20, %21, %cst_20 {dimension_numbers = #tpu.dot_dimension_numbers<[1], [0], [0], [1], [0, 0, 1, 1], [], []>} : vector<64x8xbf16>, vector<8x16xbf16>, vector<64x16xf32> -> vector<64x16xf32>
      %c0_21 = arith.constant 0 : index
      %c0_22 = arith.constant 0 : index
      %23 = vector.load %arg6[%c0_21, %c0_22] : memref<1x16xf32, #tpu.memory_space<vmem>>, vector<1x16xf32>
      %24 = vector.broadcast %23 : vector<1x16xf32> to vector<64x16xf32>
      %25 = arith.addf %22, %24 : vector<64x16xf32>
      %cst_23 = arith.constant 0.000000e+00 : f32
      %26 = vector.broadcast %cst_23 : f32 to vector<64x16xf32>
      %27 = arith.maximumf %25, %26 : vector<64x16xf32>
      %c0_24 = arith.constant 0 : index
      %c0_25 = arith.constant 0 : index
      %28 = vector.load %arg7[%c0_24, %c0_25] : memref<64x16xf32, #tpu.memory_space<vmem>>, vector<64x16xf32>
      %29 = arith.mulf %27, %28 : vector<64x16xf32>
      %30 = arith.truncf %29 : vector<64x16xf32> to vector<64x16xbf16>
      %c0_26 = arith.constant 0 : index
      %c0_27 = arith.constant 0 : index
      %31 = vector.load %arg8[%c0_26, %c0_27] : memref<16x128xbf16, #tpu.memory_space<vmem>>, vector<16x128xbf16>
      %cst_28 = arith.constant dense<0.000000e+00> : vector<64x128xf32>
      %32 = tpu.matmul %30, %31, %cst_28 {dimension_numbers = #tpu.dot_dimension_numbers<[1], [0], [0], [1], [0, 0, 1, 1], [], []>} : vector<64x16xbf16>, vector<16x128xbf16>, vector<64x128xf32> -> vector<64x128xf32>
      %33 = arith.truncf %32 : vector<64x128xf32> to vector<64x128xbf16>
      %c0_29 = arith.constant 0 : index
      %c0_30 = arith.constant 0 : index
      %c0_31 = arith.constant 0 : index
      %34 = vector.load %arg10[%c0_29, %c0_30, %c0_31] : memref<1x64x128xbf16, #tpu.memory_space<vmem>>, vector<1x64x128xbf16>
      %35 = vector.shape_cast %34 : vector<1x64x128xbf16> to vector<64x128xbf16>
      %36 = vector.shape_cast %33 : vector<64x128xbf16> to vector<1x64x128xbf16>
      tpu.vector_store %arg10[%c0_29, %c0_30, %c0_31], %36 {strides = array<i32>} : memref<1x64x128xbf16, #tpu.memory_space<vmem>>, vector<1x64x128xbf16>,
    } else {
    }
    return
  }
  func.func @transform_0(%arg0: i32, %arg1: i32) -> (i32, i32, i32) {
    %c0_i32 = arith.constant 0 : i32
    %c0_i32_0 = arith.constant 0 : i32
    return %arg0, %arg1, %c0_i32 : i32, i32, i32
  }
  func.func @transform_1(%arg0: i32, %arg1: i32) -> (i32, i32) {
    %c0_i32 = arith.constant 0 : i32
    %c0_i32_0 = arith.constant 0 : i32
    return %c0_i32, %arg1 : i32, i32
  }
  func.func @transform_2(%arg0: i32, %arg1: i32) -> (i32, i32) {
    %c0_i32 = arith.constant 0 : i32
    %c0_i32_0 = arith.constant 0 : i32
    %c0_i32_1 = arith.constant 0 : i32
    return %c0_i32, %c0_i32_0 : i32, i32
  }
  func.func @transform_3(%arg0: i32, %arg1: i32) -> (i32, i32) {
    %c0_i32 = arith.constant 0 : i32
    %c0_i32_0 = arith.constant 0 : i32
    %c0_i32_1 = arith.constant 0 : i32
    return %c0_i32, %c0_i32_0 : i32, i32
  }
  func.func @transform_4(%arg0: i32, %arg1: i32) -> (i32, i32) {
    %c0_i32 = arith.constant 0 : i32
    %c0_i32_0 = arith.constant 0 : i32
    %c0_i32_1 = arith.constant 0 : i32
    return %c0_i32, %c0_i32_0 : i32, i32
  }
  func.func @transform_5(%arg0: i32, %arg1: i32) -> (i32, i32) {
    %c0_i32 = arith.constant 0 : i32
    %c0_i32_0 = arith.constant 0 : i32
    %c0_i32_1 = arith.constant 0 : i32
    return %c0_i32, %c0_i32_0 : i32, i32
  }
  func.func @transform_6(%arg0: i32, %arg1: i32) -> (i32, i32) {
    %c0_i32 = arith.constant 0 : i32
    %c0_i32_0 = arith.constant 0 : i32
    %c0_i32_1 = arith.constant 0 : i32
    return %c0_i32, %c0_i32_0 : i32, i32
  }
  func.func @transform_7(%arg0: i32, %arg1: i32) -> (i32, i32, i32) {
    %c0_i32 = arith.constant 0 : i32
    %c0_i32_0 = arith.constant 0 : i32
    return %arg0, %arg1, %c0_i32 : i32, i32, i32
  }
  func.func @transform_8(%arg0: i32, %arg1: i32) -> (i32, i32, i32) {
    %c0_i32 = arith.constant 0 : i32
    %c0_i32_0 = arith.constant 0 : i32
    %c0_i32_1 = arith.constant 0 : i32
    return %arg0, %c0_i32, %c0_i32_0 : i32, i32, i32
  }
}

module attributes {stable_mosaic.version = 11 : i64} {
  func.func @_fuse_kernel(%arg0: i32, %arg1: i32, %arg2: memref<1x128x128xbf16, #tpu.memory_space<vmem>>, %arg3: memref<1x64x128xbf16, #tpu.memory_space<vmem>>, %arg4: memref<128x64xbf16, #tpu.memory_space<vmem>>, %arg5: memref<1x128xf32, #tpu.memory_space<vmem>>, %arg6: memref<1x128x128xbf16, #tpu.memory_space<vmem>>) attributes {dimension_semantics = [#tpu.dimension_semantics<parallel>, #tpu.dimension_semantics<parallel>], iteration_bounds = array<i64: 2, 2>, scalar_prefetch = 0 : i64, scratch_operands = 0 : i64, tpu.core_type = #tpu.core_type<tc>, window_params = [{transform_indices = @transform_0, window_bounds = array<i64: 1, 128, 128>}, {transform_indices = @transform_1, window_bounds = array<i64: 1, 64, 128>}, {transform_indices = @transform_2, window_bounds = array<i64: 128, 64>}, {pipeline_mode = #tpu.pipeline_mode<synchronous>, transform_indices = @transform_3, window_bounds = array<i64: 1, 128>}, {transform_indices = @transform_4, window_bounds = array<i64: 1, 128, 128>}]} {
    %c0 = arith.constant 0 : index
    %c0_0 = arith.constant 0 : index
    %c0_1 = arith.constant 0 : index
    %0 = vector.load %arg2[%c0, %c0_0, %c0_1] : memref<1x128x128xbf16, #tpu.memory_space<vmem>>, vector<1x128x128xbf16>
    %1 = vector.shape_cast %0 : vector<1x128x128xbf16> to vector<128x128xbf16>
    %2 = arith.extf %1 : vector<128x128xbf16> to vector<128x128xf32>
    %c0_2 = arith.constant 0 : index
    %c0_3 = arith.constant 0 : index
    %3 = vector.load %arg4[%c0_2, %c0_3] : memref<128x64xbf16, #tpu.memory_space<vmem>>, vector<128x64xbf16>
    %c0_4 = arith.constant 0 : index
    %c0_5 = arith.constant 0 : index
    %c0_6 = arith.constant 0 : index
    %4 = vector.load %arg3[%c0_4, %c0_5, %c0_6] : memref<1x64x128xbf16, #tpu.memory_space<vmem>>, vector<1x64x128xbf16>
    %5 = vector.shape_cast %4 : vector<1x64x128xbf16> to vector<64x128xbf16>
    %cst = arith.constant dense<0.000000e+00> : vector<128x128xf32>
    %6 = tpu.matmul %3, %5, %cst {dimension_numbers = #tpu.dot_dimension_numbers<[1], [0], [0], [1], [0, 0, 1, 1], [], []>} : vector<128x64xbf16>, vector<64x128xbf16>, vector<128x128xf32> -> vector<128x128xf32>
    %7 = arith.addf %2, %6 : vector<128x128xf32>
    %c0_7 = arith.constant 0 : index
    %c0_8 = arith.constant 0 : index
    %8 = vector.load %arg5[%c0_7, %c0_8] : memref<1x128xf32, #tpu.memory_space<vmem>>, vector<1x128xf32>
    %9 = vector.broadcast %8 : vector<1x128xf32> to vector<128x128xf32>
    %10 = arith.addf %7, %9 : vector<128x128xf32>
    %cst_9 = arith.constant 0.000000e+00 : f32
    %11 = vector.broadcast %cst_9 : f32 to vector<128x128xf32>
    %12 = arith.maximumf %10, %11 : vector<128x128xf32>
    %13 = arith.truncf %12 : vector<128x128xf32> to vector<128x128xbf16>
    %c0_10 = arith.constant 0 : index
    %c0_11 = arith.constant 0 : index
    %c0_12 = arith.constant 0 : index
    %14 = vector.load %arg6[%c0_10, %c0_11, %c0_12] : memref<1x128x128xbf16, #tpu.memory_space<vmem>>, vector<1x128x128xbf16>
    %15 = vector.shape_cast %14 : vector<1x128x128xbf16> to vector<128x128xbf16>
    %16 = vector.shape_cast %13 : vector<128x128xbf16> to vector<1x128x128xbf16>
    tpu.vector_store %arg6[%c0_10, %c0_11, %c0_12], %16 {strides = array<i32>} : memref<1x128x128xbf16, #tpu.memory_space<vmem>>, vector<1x128x128xbf16>,
    return
  }
  func.func @transform_0(%arg0: i32, %arg1: i32) -> (i32, i32, i32) {
    %c0_i32 = arith.constant 0 : i32
    %c0_i32_0 = arith.constant 0 : i32
    return %arg0, %arg1, %c0_i32 : i32, i32, i32
  }
  func.func @transform_1(%arg0: i32, %arg1: i32) -> (i32, i32, i32) {
    %c0_i32 = arith.constant 0 : i32
    %c0_i32_0 = arith.constant 0 : i32
    %c0_i32_1 = arith.constant 0 : i32
    return %arg0, %c0_i32, %c0_i32_0 : i32, i32, i32
  }
  func.func @transform_2(%arg0: i32, %arg1: i32) -> (i32, i32) {
    %c0_i32 = arith.constant 0 : i32
    %c0_i32_0 = arith.constant 0 : i32
    return %arg1, %c0_i32 : i32, i32
  }
  func.func @transform_3(%arg0: i32, %arg1: i32) -> (i32, i32) {
    %c0_i32 = arith.constant 0 : i32
    %c0_i32_0 = arith.constant 0 : i32
    %c0_i32_1 = arith.constant 0 : i32
    return %c0_i32, %c0_i32_0 : i32, i32
  }
  func.func @transform_4(%arg0: i32, %arg1: i32) -> (i32, i32, i32) {
    %c0_i32 = arith.constant 0 : i32
    %c0_i32_0 = arith.constant 0 : i32
    return %arg0, %arg1, %c0_i32 : i32, i32, i32
  }
}

</mosaic_0001>

<bundles_post_ra>
// kernel: pyramid_pooling_forward.2
= control target key start
LH: loop header
LB: loop body
LE: loop exit
PB: predicated region body
PF: predicated region fallthrough
CT: control target
= control target key end

     0   :  { %s1555_s0 = inlined_call_operand.vmem [shape: bf16[2,256,8], index: 0, kind: input, shape index: {}]   ;;  %s1556_s1 = inlined_call_operand.vmem [shape: bf16[64,256], index: 1, kind: input, shape index: {}]   ;;  %s1557_s2 = inlined_call_operand.vmem [shape: bf16[8,128], index: 2, kind: input, shape index: {}]   ;;  %s1558_s3 = inlined_call_operand.vmem [shape: bf16[8,16], index: 3, kind: input, shape index: {}]   ;;  %s1559_s4 = inlined_call_operand.vmem [shape: f32[1,16], index: 4, kind: input, shape index: {}]   ;;  %s1560_s5 = inlined_call_operand.vmem [shape: f32[64,16], index: 5, kind: input, shape index: {}]   ;;  %s1561_s6 = inlined_call_operand.vmem [shape: bf16[16,128], index: 6, kind: input, shape index: {}]   ;;  %s1562_s7 = inlined_call_operand.vmem [shape: bf16[2,256,128], index: 7, kind: output, shape index: {0}]   ;;  %s1563_s8 = inlined_call_operand.vmem [shape: bf16[2,64,128], index: 8, kind: output, shape index: {1}]  }
   0x1   :  { %1564 = sst [smem:[#allocation5_spill]] %s1556_s1 }
   0x2   :  { %s1366_s27 = smov 0   ;;  %s1368_s28 = smov 0  }
   0x3   :  { %s1370_s29 = smov 0   ;;  %s1372_s30 = smov 0  }
   0x4   :  { %s1374_s9 = smov 0   ;;  %s1376_s10 = smov 0  }
   0x5   :  { %s1378_s11 = smov 0  }
   0x6 LB: > { %s28_s12 = sadd.s32 1, %s1310_s9  ;;  %s31_s13 = sadd.s32 1, %s1314_s10  ;;  %s1318_s11 = sphi %s1378_s11, %s19_s11   ;;  %s1314_s10 = sphi %s1376_s10, %s1573_s10   ;;  %s1310_s9 = sphi %s1374_s9, %s1572_s9   ;;  %s1306_s30 = sphi %s1372_s30, %s1571_s30   ;;  %s1302_s29 = sphi %s1370_s29, %s1570_s29   ;;  %s1298_s28 = sphi %s1368_s28, %s1569_s28   ;;  %s1294_s27 = sphi %s1366_s27, %s1568_s27  }
   0x7   : > { %p29_p0 = scmp.ge.s32.totalorder %s28_s12, 2  ;;  %s66_s14 = sadd.s32 1, %s1298_s28 }
   0x8   : > { %p73_p1 = scmp.ne.s32.totalorder %s1298_s28, %s1294_s27  ;;  %p74_p2 = scmp.eq.s32.totalorder %s1318_s11, 0 }
   0x9   : > { %s1575_s12 = smov (%p29_p0, %s28_s12), 0  ;;  %s1577_s13 = smov (!%p29_p0, %s31_s13), %s1314_s10 }
   0xa   : > { %s63_s15 = ssub.s32 %s1310_s9, %s1575_s12  ;;  %p75_p3 = por %p74_p2, %p73_p1 }
   0xb   : > { %p33_p4 = scmp.ge.s32.totalorder %s1577_s13, 2  ;;  %p64_p5 = scmp.eq.s32.totalorder %s63_s15, 0 }
   0xc   : > { %p1026_p6 = scmp.ge.s32.totalorder %s1318_s11, 4 }
   0xd   : > { %s1579_s13 = smov (%p33_p4, %s1577_s13), 0 }
   0xe   : > { %1565 = sst [smem:[#allocation4_spill]] %s1579_s13  ;;  %273 = sbr.rel (%p1026_p6) target bundleno = 37 (0x25), region = 36 }
   0xf   : > { %s1415_s16 = scalar_select %p64_p5, %s1298_s28, %s66_s14  }
  0x13   : > { %289 = sbr.rel (!%p75_p3) target bundleno = 37 (0x25), region = 44  ;;  %s291_s17 = sand.u32 (%p75_p3), 1, %s1298_s28  }
  0x14   : > { %s1028_s18 = sshll.u32 (%p75_p3), %s1310_s9, 2  ;;  %s1027_s19 = sshll.u32 (%p75_p3), %s291_s17, 5 }
  0x15   : > { %s1566_s1 = sld [smem:[#allocation5_spill]] (%p75_p3)  ;;  %s293_s23 = scalar_lea.vmem (%p75_p3), [#allocation3], %s1027_s19 }
  0x1b   : > { %s295_s22 = scalar_lea.vmem %s1566_s1, %s1028_s18 }
  0x1c   : > { %v312_v0 = vld [vmem:[%s295_s22] sm:$0xf]  ;;  %v314_v1 = vld [vmem:[%s295_s22 + $0x8] sm:$0xf]  ;;  %v316_v2 = vld [vmem:[%s295_s22 + $0x10] sm:$0xf] }
  0x1d   : > { %313 = vst [vmem:[%s293_s23] sm:$0xf] %v312_v0  ;;  %v318_v3 = vld [vmem:[%s295_s22 + $0x18] sm:$0xf]  ;;  %v320_v4 = vld [vmem:[%s295_s22 + $0x20] sm:$0xf] }
  0x1e   : > { %315 = vst [vmem:[%s293_s23 + $0x4] sm:$0xf] %v314_v1  ;;  %v322_v5 = vld [vmem:[%s295_s22 + $0x28] sm:$0xf]  ;;  %v324_v6 = vld [vmem:[%s295_s22 + $0x30] sm:$0xf] }
  0x1f   : > { %317 = vst [vmem:[%s293_s23 + $0x8] sm:$0xf] %v316_v2  ;;  %v326_v7 = vld [vmem:[%s295_s22 + $0x38] sm:$0xf] }
  0x20   : > { %319 = vst [vmem:[%s293_s23 + $0xc] sm:$0xf] %v318_v3 }
  0x21   : > { %321 = vst [vmem:[%s293_s23 + $0x10] sm:$0xf] %v320_v4 }
  0x22   : > { %323 = vst [vmem:[%s293_s23 + $0x14] sm:$0xf] %v322_v5 }
  0x23   : > { %325 = vst [vmem:[%s293_s23 + $0x18] sm:$0xf] %v324_v6 }
  0x24   : > { %327 = vst [vmem:[%s293_s23 + $0x1c] sm:$0xf] %v326_v7 }
  0x25 PF: > { %p1029_p7 = scmp.ge.s32.totalorder %s1318_s11, 1  ;;  %p366_p8 = scmp.lt.s32.totalorder %s1318_s11, 5 }
  0x27   : > { %p367_p9 = pnand %p1029_p7, %p366_p8 }
  0x28   : > { %s373_s24 = sand.u32 (!%p367_p9), 1, %s1294_s27   ;;  %s1031_s25 = sshll.u32 (!%p367_p9), %s1302_s29, 4 }
  0x29   : > { %370 = sbr.rel (%p367_p9) target bundleno = 580 (0x244), region = 85  ;;  %s1030_s26 = sshll.u32 (!%p367_p9), %s373_s24, 5 }
  0x2a   : > { %p425_p10 = scmp.lt.s32.totalorder (!%p367_p9), %s1306_s30, 1  ;;  %p427_p11 = scmp.lt.s32.totalorder (!%p367_p9), %s1031_s25, 31 }
  0x2b   : > { %s1444_s13 = scalar_lea.vmem (!%p367_p9), [#allocation3], %s1030_s26  ;;  %p1039_p12 = scmp.ne.s32.totalorder (!%p367_p9), %s1302_s29, 0 }
  0x2e   : > { %s1581_s30 = smov (!%p425_p10, %s1306_s30), 1  ;;  %s1583_s25 = smov (!%p427_p11, %s1031_s25), 31 }
  0x2f   : > { %s1032_s14 = sshll.u32 %s1581_s30, 5  ;;  %453 = sbr.rel (%p1039_p12) target bundleno = 61 (0x3d), region = 93 }
  0x30   : > { %s430_s15 = sadd.s32 %s1032_s14, %s1583_s25  ;;  %s1432_s19 = scalar_lea.vmem %s1563_s8, %s1032_s14 }
  0x31   : > { %s1033_s20 = sshll.u32 %s430_s15, 2 }
  0x32   : > { %s1437_s23 = scalar_lea.vmem %s1555_s0, %s1033_s20  ;;  %s1442_s24 = scalar_lea.vmem %s1562_s7, %s1033_s20 }
  0x34   : > { %vm454_vm0 = vcmask 64512   ;;  %v1320_v8 = vmov 0.0  }
  0x35   : > { %455 = vst.msk [vmem:[#allocation2] sm:$0xff] %vm454_vm0, %v1320_v8 }
  0x36   : > { %456 = vst.msk [vmem:[#allocation2 + $0x8] sm:$0xff] %vm454_vm0, %v1320_v8 }
  0x37   : > { %457 = vst.msk [vmem:[#allocation2 + $0x10] sm:$0xff] %vm454_vm0, %v1320_v8 }
  0x38   : > { %458 = vst.msk [vmem:[#allocation2 + $0x18] sm:$0xff] %vm454_vm0, %v1320_v8 }
  0x39   : > { %459 = vst.msk [vmem:[#allocation2 + $0x20] sm:$0xff] %vm454_vm0, %v1320_v8 }
  0x3a   : > { %460 = vst.msk [vmem:[#allocation2 + $0x28] sm:$0xff] %vm454_vm0, %v1320_v8 }
  0x3b   : > { %461 = vst.msk [vmem:[#allocation2 + $0x30] sm:$0xff] %vm454_vm0, %v1320_v8 }
  0x3c   : > { %462 = vst.msk [vmem:[#allocation2 + $0x38] sm:$0xff] %vm454_vm0, %v1320_v8 }
  0x3d PF: > { %v1119_v9 = vld [vmem:[%s1437_s23 + $0x38] sm:$0xff]  ;;  %v613_v10 = vld [vmem:[%s1557_s2] sm:$0xf]  ;;  %vm638_vm1 = vcmask 1043456   ;;  %v1118_v13 = vld [vmem:[%s1437_s23 + $0x30] sm:$0xff]  ;;  %vm604_vm2 = vcmask 64512  }
  0x3e   : > { %v640_v11 = vsel %vm638_vm1, %v613_v10, 0  ;;  %v1116_v12 = vld [vmem:[%s1437_s23 + $0x20] sm:$0xff]  ;;  %1195 = vmatpush.bf16.msra.mxu3 %v1119_v9  ;;  %567 = vmatpush.bf16.msra.mxu0 %v1119_v9  ;;  %v1117_v15 = vld [vmem:[%s1437_s23 + $0x28] sm:$0xff]  ;;  %v1115_v16 = vld [vmem:[%s1437_s23 + $0x18] sm:$0xff]  ;;  %p1096_p13 = scmp.ne.s32.totalorder %s1302_s29, 1 }
  0x3f   : > { %1203 = vmatpush.bf16.msra.mxu2 %v640_v11  ;;  %v1112_v14 = vld [vmem:[%s1437_s23] sm:$0xff]  ;;  %649 = vmatpush.bf16.msra.mxu1 %v640_v11  ;;  %v1114_v17 = vld [vmem:[%s1437_s23 + $0x10] sm:$0xff]  ;;  %v1113_v18 = vld [vmem:[%s1437_s23 + $0x8] sm:$0xff] }
  0x40   : > { %v1121_v19 = vld [vmem:[%s1444_s13 + $0x8] sm:$0xff]  ;;  %v1120_v20 = vld [vmem:[%s1444_s13] sm:$0xff]  ;;  %v1122_v21 = vld [vmem:[%s1444_s13 + $0x10] sm:$0xff] }
  0x41   : > { %v1123_v22 = vld [vmem:[%s1444_s13 + $0x18] sm:$0xff]  ;;  %v479_v33 = vld [vmem:[#allocation2] sm:$0xff]  ;;  %v481_v38 = vld [vmem:[#allocation2 + $0x10] sm:$0xff] }
  0x42   : > { %1092 = vmatmul.msk.bf16.vlgmr.msra.gmra.mxu2 %vm604_vm2, %v1116_v12  ;;  %1196 = vmatpush.bf16.msra.mxu3 %v1118_v13  ;;  %v480_v42 = vld [vmem:[#allocation2 + $0x8] sm:$0xff]  ;;  %v482_v46 = vld [vmem:[#allocation2 + $0x18] sm:$0xff]  ;;  %v483_v53 = vld [vmem:[#allocation2 + $0x20] sm:$0xff] }
  0x43   : > { %1088 = vmatmul.msk.bf16.vlgmr.msra.gmra.mxu1 %vm604_vm2, %v1112_v14  ;;  %568 = vmatpush.bf16.msra.mxu0 %v1118_v13  ;;  %v484_v58 = vld [vmem:[#allocation2 + $0x28] sm:$0xff]  ;;  %v485_v1 = vld [vmem:[#allocation2 + $0x30] sm:$0xff]  ;;  %v486_v4 = vld [vmem:[#allocation2 + $0x38] sm:$0xff] }
  0x46   : > { %1197 = vmatpush.bf16.msra.mxu3 %v1117_v15 }
  0x47   : > { %569 = vmatpush.bf16.msra.mxu0 %v1117_v15 }
  0x4a   : > { %1198 = vmatpush.bf16.msra.mxu3 %v1116_v12 }
  0x4b   : > { %570 = vmatpush.bf16.msra.mxu0 %v1116_v12 }
  0x4e   : > { %1199 = vmatpush.bf16.msra.mxu3 %v1115_v16 }
  0x4f   : > { %571 = vmatpush.bf16.msra.mxu0 %v1115_v16 }
  0x52   : > { %1093 = vmatmul.msk.bf16.gmra.mxu2 %vm604_vm2, %v1117_v15  ;;  %1200 = vmatpush.bf16.msra.mxu3 %v1114_v17 }
  0x53   : > { %1089 = vmatmul.msk.bf16.gmra.mxu1 %vm604_vm2, %v1113_v18  ;;  %572 = vmatpush.bf16.msra.mxu0 %v1114_v17 }
  0x56   : > { %1201 = vmatpush.bf16.msra.mxu3 %v1113_v18 }
  0x57   : > { %573 = vmatpush.bf16.msra.mxu0 %v1113_v18 }
  0x5a   : > { %1202 = vmatpush.bf16.msra.mxu3 %v1112_v14 }
  0x5b   : > { %574 = vmatpush.bf16.msra.mxu0 %v1112_v14 }
  0x5d   : > { %580 = vmatmul.bf16.vlgmr.msra.gmra.mxu3 %v1121_v19 }
  0x5e   : > { %575 = vmatmul.bf16.vlgmr.msra.gmra.mxu0 %v1120_v20 }
  0x62   : > { %1094 = vmatmul.msk.bf16.gmra.mxu2 %vm604_vm2, %v1118_v13 }
  0x63   : > { %1090 = vmatmul.msk.bf16.gmra.mxu1 %vm604_vm2, %v1114_v17 }
  0x6d   : > { %585 = vmatmul.bf16.gmra.mxu3 %v1122_v21 }
  0x72   : > { %1095 = vmatmul.msk.bf16.gmra.mxu2 %vm604_vm2, %v1119_v9 }
  0x73   : > { %1091 = vmatmul.msk.bf16.gmra.mxu1 %vm604_vm2, %v1115_v16 }
  0x7d   : > { %590 = vmatmul.bf16.gmra.mxu3 %v1123_v22 }
  0xc0   : > { %v651_v23 = vpop.f32.mrf.mxu1 }
  0xc5   : > { %v671_v24 = vpop.f32.mrf.mxu2 }
  0xc8   : > { %v653_v25 = vpop.f32.mrf.mxu1 }
  0xc9   : > { %v1128_v26 = vpack.c.bf16 %v653_v25, %v651_v23 }
  0xcb   : > { %1129 = vst [vmem:[%s1442_s24] sm:$0xff] %v1128_v26  }
  0xcd   : > { %v673_v27 = vpop.f32.mrf.mxu2 }
  0xce   : > { %v1148_v28 = vpack.c.bf16 %v673_v27, %v671_v24 }
  0xd0   : > { %1188 = vst [vmem:[%s1442_s24 + $0x20] sm:$0xff] %v1148_v28   ;;  %v656_v29 = vpop.f32.mrf.mxu1 }
  0xd5   : > { %v676_v30 = vpop.f32.mrf.mxu2 }
  0xd8   : > { %v658_v31 = vpop.f32.mrf.mxu1 }
  0xd9   : > { %v1133_v32 = vpack.c.bf16 %v658_v31, %v656_v29 }
  0xdb   : > { %1185 = vst [vmem:[%s1442_s24 + $0x8] sm:$0xff] %v1133_v32   ;;  %v576_v34 = vpop.f32.mrf.mxu0 }
  0xdc   : > { %v596_v36 = vadd.f32 %v576_v34, %v479_v33 }
  0xdd   : > { %v678_v35 = vpop.f32.mrf.mxu2 }
  0xde   : > { %v1153_v37 = vpack.c.bf16 %v678_v35, %v676_v30  ;;  %605 = vst.msk [vmem:[#allocation2] sm:$0xff] %vm604_vm2, %v596_v36 }
  0xe0   : > { %1189 = vst [vmem:[%s1442_s24 + $0x28] sm:$0xff] %v1153_v37   ;;  %v661_v39 = vpop.f32.mrf.mxu1  ;;  %v581_v40 = vpop.f32.mrf.mxu3 }
  0xe1   : > { %v598_v41 = vadd.f32 %v581_v40, %v481_v38 }
  0xe3   : > { %607 = vst.msk [vmem:[#allocation2 + $0x10] sm:$0xff] %vm604_vm2, %v598_v41  ;;  %v578_v43 = vpop.f32.mrf.mxu0 }
  0xe4   : > { %v597_v45 = vadd.f32 %v578_v43, %v480_v42 }
  0xe5   : > { %v681_v44 = vpop.f32.mrf.mxu2 }
  0xe6   : > { %606 = vst.msk [vmem:[#allocation2 + $0x8] sm:$0xff] %vm604_vm2, %v597_v45 }
  0xe8   : > { %v663_v47 = vpop.f32.mrf.mxu1  ;;  %v583_v48 = vpop.f32.mrf.mxu3 }
  0xe9   : > { %v1138_v49 = vpack.c.bf16 %v663_v47, %v661_v39  ;;  %v599_v50 = vadd.f32 %v583_v48, %v482_v46 }
  0xeb   : > { %1186 = vst [vmem:[%s1442_s24 + $0x10] sm:$0xff] %v1138_v49  }
  0xec   : > { %608 = vst.msk [vmem:[#allocation2 + $0x18] sm:$0xff] %vm604_vm2, %v599_v50 }
  0xed   : > { %v683_v51 = vpop.f32.mrf.mxu2 }
  0xee   : > { %v1158_v52 = vpack.c.bf16 %v683_v51, %v681_v44 }
  0xf0   : > { %1190 = vst [vmem:[%s1442_s24 + $0x30] sm:$0xff] %v1158_v52   ;;  %v666_v54 = vpop.f32.mrf.mxu1  ;;  %v586_v55 = vpop.f32.mrf.mxu3 }
  0xf1   : > { %v600_v56 = vadd.f32 %v586_v55, %v483_v53 }
  0xf3   : > { %609 = vst.msk [vmem:[#allocation2 + $0x20] sm:$0xff] %vm604_vm2, %v600_v56 }
  0xf5   : > { %v686_v57 = vpop.f32.mrf.mxu2 }
  0xf8   : > { %v668_v59 = vpop.f32.mrf.mxu1  ;;  %v588_v60 = vpop.f32.mrf.mxu3 }
  0xf9   : > { %v1143_v61 = vpack.c.bf16 %v668_v59, %v666_v54  ;;  %v601_v62 = vadd.f32 %v588_v60, %v484_v58 }
  0xfb   : > { %1187 = vst [vmem:[%s1442_s24 + $0x18] sm:$0xff] %v1143_v61  }
  0xfc   : > { %610 = vst.msk [vmem:[#allocation2 + $0x28] sm:$0xff] %vm604_vm2, %v601_v62 }
  0xfd   : > { %v688_v63 = vpop.f32.mrf.mxu2 }
  0xfe   : > { %v1163_v0 = vpack.c.bf16 %v688_v63, %v686_v57 }
 0x100   : > { %1191 = vst [vmem:[%s1442_s24 + $0x38] sm:$0xff] %v1163_v0   ;;  %v591_v2 = vpop.f32.mrf.mxu3 }
 0x101   : > { %v602_v3 = vadd.f32 %v591_v2, %v485_v1 }
 0x103   : > { %611 = vst.msk [vmem:[#allocation2 + $0x30] sm:$0xff] %vm604_vm2, %v602_v3 }
 0x107   : > { %726 = sbr.rel (%p1096_p13) target bundleno = 580 (0x244), region = 97 }
 0x108   : > { %v593_v5 = vpop.f32.mrf.mxu3 }
 0x109   : > { %v603_v6 = vadd.f32 %v593_v5, %v486_v4 }
 0x10b   : > { %612 = vst.msk [vmem:[#allocation2 + $0x38] sm:$0xff] %vm604_vm2, %v603_v6 }
 0x10c   : > { %v739_v7 = vld [vmem:[%s1558_s3] sm:$0xf]  ;;  %v728_v9 = vld [vmem:[#allocation2 + $0x8] sm:$0xff]  ;;  %v729_v15 = vld [vmem:[#allocation2 + $0x10] sm:$0xff]  ;;  %vm824_vm3 = vcmask 130048  }
 0x10d   : > { %v727_v8 = vld [vmem:[#allocation2] sm:$0xff]  ;;  %v757_v10 = vsel %vm638_vm1, %v739_v7, 0  ;;  %v732_v13 = vld [vmem:[#allocation2 + $0x28] sm:$0xff]  ;;  %v730_v16 = vld [vmem:[#allocation2 + $0x18] sm:$0xff] }
 0x10e   : > { %v735_v11 = vpack.c.bf16 %v728_v9, %v727_v8  ;;  %v731_v12 = vld [vmem:[#allocation2 + $0x20] sm:$0xff]  ;;  %766 = vmatpush.bf16.msra.mxu0 %v757_v10  ;;  %1204 = vmatpush.bf16.msra.mxu2 %v757_v10  ;;  %v733_v17 = vld [vmem:[#allocation2 + $0x30] sm:$0xff]  ;;  %v736_v19 = vpack.c.bf16 %v730_v16, %v729_v15  ;;  %v797_v30 = vld [vmem:[%s1560_s5 + $0x8] sm:$0xff] }
 0x10f   : > { %v737_v14 = vpack.c.bf16 %v732_v13, %v731_v12  ;;  %v1124_v21 = vld [vmem:[%s1561_s6] sm:$0xff]  ;;  %v801_v40 = vld [vmem:[%s1560_s5 + $0x28] sm:$0xff]  ;;  %v798_v49 = vld [vmem:[%s1560_s5 + $0x10] sm:$0xff] }
 0x110   : > { %844 = vmatpush.bf16.msra.mxu1 %v1124_v21  ;;  %1205 = vmatpush.bf16.msra.mxu3 %v1124_v21  ;;  %v1263_v23 = vld [vmem:[%s1559_s4] ss:$0 sm:$0xff]  ;;  %v799_v52 = vld [vmem:[%s1560_s5 + $0x18] sm:$0xff]  ;;  %v802_v61 = vld [vmem:[%s1560_s5 + $0x30] sm:$0xff] }
 0x111   : > { %1097 = vmatmul.msk.bf16.vlgmr.msra.gmra.mxu0 %vm604_vm2, %v735_v11  ;;  %1099 = vmatmul.msk.bf16.vlgmr.msra.gmra.mxu2 %vm604_vm2, %v737_v14  ;;  %v796_v27 = vld [vmem:[%s1560_s5] sm:$0xff]  ;;  %v803_v62 = vld [vmem:[%s1560_s5 + $0x38] sm:$0xff] }
 0x112   : > { %v734_v18 = vld [vmem:[#allocation2 + $0x38] sm:$0xff]  ;;  %v800_v39 = vld [vmem:[%s1560_s5 + $0x20] sm:$0xff] }
 0x113   : > { %v738_v20 = vpack.c.bf16 %v734_v18, %v733_v17 }
 0x121   : > { %1098 = vmatmul.msk.bf16.gmra.mxu0 %vm604_vm2, %v736_v19  ;;  %1100 = vmatmul.msk.bf16.gmra.mxu2 %vm604_vm2, %v738_v20 }
 0x18e   : > { %v768_v22 = vpop.f32.mrf.mxu0 }
 0x18f   : > { %v769_v24 = vadd.f32 %v1263_v23, %v768_v22 }
 0x191   : > { %v788_v26 = vmax.f32 %v769_v24, 0.0 }
 0x193   : > { %v804_v31 = vmul.f32 %v796_v27, %v788_v26 }
 0x194   : > { %v778_v25 = vpop.f32.mrf.mxu2 }
 0x195   : > { %v779_v32 = vadd.f32 %v1263_v23, %v778_v25 }
 0x196   : > { %v770_v28 = vpop.f32.mrf.mxu0 }
 0x197   : > { %v771_v29 = vadd.f32 %v1263_v23, %v770_v28  ;;  %v792_v36 = vmax.f32 %v779_v32, 0.0 }
 0x199   : > { %v789_v33 = vmax.f32 %v771_v29, 0.0  ;;  %v808_v43 = vmul.f32 %v800_v39, %v792_v36 }
 0x19b   : > { %v805_v34 = vmul.f32 %v797_v30, %v789_v33 }
 0x19c   : > { %v780_v35 = vpop.f32.mrf.mxu2 }
 0x19d   : > { %v781_v37 = vadd.f32 %v1263_v23, %v780_v35  ;;  %v812_v38 = vpack.c.bf16 %v805_v34, %v804_v31 }
 0x19e   : > { %v773_v41 = vpop.f32.mrf.mxu0 }
 0x19f   : > { %v793_v42 = vmax.f32 %v781_v37, 0.0  ;;  %1105 = vmatmul.msk.bf16.vlgmr.msra.gmra.mxu1 %vm824_vm3, %v812_v38  ;;  %v774_v45 = vadd.f32 %v1263_v23, %v773_v41 }
 0x1a1   : > { %v809_v44 = vmul.f32 %v801_v40, %v793_v42  ;;  %v790_v48 = vmax.f32 %v774_v45, 0.0 }
 0x1a3   : > { %v814_v46 = vpack.c.bf16 %v809_v44, %v808_v43  ;;  %v806_v53 = vmul.f32 %v798_v49, %v790_v48 }
 0x1a4   : > { %v783_v47 = vpop.f32.mrf.mxu2 }
 0x1a5   : > { %1107 = vmatmul.msk.bf16.vlgmr.msra.gmra.mxu3 %vm824_vm3, %v814_v46  ;;  %v784_v54 = vadd.f32 %v1263_v23, %v783_v47 }
 0x1a6   : > { %v775_v50 = vpop.f32.mrf.mxu0 }
 0x1a7   : > { %v776_v51 = vadd.f32 %v1263_v23, %v775_v50  ;;  %v794_v58 = vmax.f32 %v784_v54, 0.0 }
 0x1a9   : > { %v791_v55 = vmax.f32 %v776_v51, 0.0  ;;  %v810_v0 = vmul.f32 %v802_v61, %v794_v58 }
 0x1ab   : > { %v807_v56 = vmul.f32 %v799_v52, %v791_v55 }
 0x1ac   : > { %v785_v57 = vpop.f32.mrf.mxu2 }
 0x1ad   : > { %v786_v59 = vadd.f32 %v1263_v23, %v785_v57  ;;  %v813_v60 = vpack.c.bf16 %v807_v56, %v806_v53 }
 0x1af   : > { %v795_v63 = vmax.f32 %v786_v59, 0.0  ;;  %1106 = vmatmul.msk.bf16.gmra.mxu1 %vm824_vm3, %v813_v60 }
 0x1b1   : > { %v811_v1 = vmul.f32 %v803_v62, %v795_v63 }
 0x1b3   : > { %v815_v2 = vpack.c.bf16 %v811_v1, %v810_v0 }
 0x1b5   : > { %1108 = vmatmul.msk.bf16.gmra.mxu3 %vm824_vm3, %v815_v2 }
 0x21c   : > { %v846_v3 = vpop.f32.mrf.mxu1 }
 0x224   : > { %v848_v4 = vpop.f32.mrf.mxu1 }
 0x225   : > { %v1168_v5 = vpack.c.bf16 %v848_v4, %v846_v3 }
 0x227   : > { %1169 = vst [vmem:[%s1432_s19] sm:$0xff] %v1168_v5  }
 0x228   : > { %v856_v6 = vpop.f32.mrf.mxu3 }
 0x22c   : > { %v851_v7 = vpop.f32.mrf.mxu1 }
 0x230   : > { %v858_v8 = vpop.f32.mrf.mxu3 }
 0x231   : > { %v1178_v9 = vpack.c.bf16 %v858_v8, %v856_v6 }
 0x233   : > { %1193 = vst [vmem:[%s1432_s19 + $0x10] sm:$0xff] %v1178_v9  }
 0x234   : > { %v853_v10 = vpop.f32.mrf.mxu1 }
 0x235   : > { %v1173_v11 = vpack.c.bf16 %v853_v10, %v851_v7 }
 0x237   : > { %1192 = vst [vmem:[%s1432_s19 + $0x8] sm:$0xff] %v1173_v11  }
 0x238   : > { %v861_v12 = vpop.f32.mrf.mxu3 }
 0x240   : > { %v863_v13 = vpop.f32.mrf.mxu3 }
 0x241   : > { %v1183_v14 = vpack.c.bf16 %v863_v13, %v861_v12 }
 0x243   : > { %1194 = vst [vmem:[%s1432_s19 + $0x18] sm:$0xff] %v1183_v14  }
 0x244 PF: > { %s19_s11 = sadd.s32 1, %s1318_s11   ;;  %s1567_s17 = sld [smem:[#allocation4_spill]] }
 0x245   : > { %p16_p0 = scmp.ge.s32.totalorder %s19_s11, 6   ;;  %s1568_s27 = smov %s1298_s28 }
 0x246   : > { %s1569_s28 = smov %s1415_s16  ;;  %s1570_s29 = smov %s1310_s9 }
 0x247   : > { %s1571_s30 = smov %s1314_s10  ;;  %s1572_s9 = smov %s1575_s12 }
 0x248   :  { %18 = sbr.rel (!%p16_p0) target bundleno = 6 (0x6), region = 147 }
 0x24a   : > { %s1573_s10 = smov %s1567_s17 }

// kernel: pyramid_pooling_forward.3
= control target key start
LH: loop header
LB: loop body
LE: loop exit
PB: predicated region body
PF: predicated region fallthrough
CT: control target
= control target key end

     0   :  { %s962_s15 = smov 0   ;;  %s964_s16 = smov 0   ;;  %s1075_s0 = inlined_call_operand.vmem [shape: bf16[2,256,128], index: 0, kind: input, shape index: {}]   ;;  %s1076_s1 = inlined_call_operand.vmem [shape: bf16[2,64,128], index: 1, kind: input, shape index: {}]   ;;  %s1077_s2 = inlined_call_operand.vmem [shape: bf16[256,64], index: 2, kind: input, shape index: {}]   ;;  %s1078_s3 = inlined_call_operand.vmem [shape: f32[1,128], index: 3, kind: input, shape index: {}]   ;;  %s1079_s4 = inlined_call_operand.vmem [shape: bf16[2,256,128], index: 4, kind: output, shape index: {}]  }
   0x1   :  { %s966_s17 = smov 0   ;;  %s968_s18 = smov 0  }
   0x2   :  { %s970_s19 = smov 0  }
   0x3 LB: > { %s23_s20 = sadd.s32 1, %s927_s17  ;;  %s26_s21 = sadd.s32 1, %s931_s18  ;;  %s935_s19 = sphi %s970_s19, %s14_s19   ;;  %s931_s18 = sphi %s968_s18, %s1083_s18   ;;  %s927_s17 = sphi %s966_s17, %s1082_s17   ;;  %s923_s16 = sphi %s964_s16, %s1081_s16   ;;  %s919_s15 = sphi %s962_s15, %s1080_s15  }
   0x4   : > { %p24_p0 = scmp.ge.s32.totalorder %s23_s20, 2  ;;  %p676_p1 = scmp.ge.s32.totalorder %s935_s19, 1 }
   0x5   : > { %p204_p2 = scmp.lt.s32.totalorder %s935_s19, 5 }
   0x6   : > { %s1085_s20 = smov (%p24_p0, %s23_s20), 0  ;;  %s1087_s21 = smov (!%p24_p0, %s26_s21), %s931_s18 }
   0x7   : > { %p205_p3 = pnand %p676_p1, %p204_p2  ;;  %p28_p4 = scmp.ge.s32.totalorder %s1087_s21, 2 }
   0x8   : > { %p249_p5 = scmp.lt.s32.totalorder (!%p205_p3), %s923_s16, 1  ;;  %s677_s22 = sshll.u32 (!%p205_p3), %s919_s15, 4 }
   0x9   : > { %s1089_s21 = smov (%p28_p4, %s1087_s21), 0  ;;  %208 = sbr.rel (%p205_p3) target bundleno = 200 (0xc8), region = 36 }
   0xa   : > { %p251_p6 = scmp.lt.s32.totalorder (!%p205_p3), %s677_s22, 31 }
   0xe   : > { %s1091_s16 = smov (!%p249_p5, %s923_s16), 1  ;;  %s1093_s22 = smov (!%p251_p6, %s677_s22), 31  ;;  %vm400_vm0 = vcmask 523264   ;;  %v1021_v19 = vld [vmem:[%s1078_s3] ss:$0 sm:$0xff] }
   0xf   : > { %s678_s23 = sshll.u32 %s1091_s16, 5  ;;  %s683_s28 = sshll.u32 %s1093_s22, 2 }
  0x10   : > { %s262_s26 = scalar_lea.vmem %s1076_s1, %s678_s23  ;;  %s995_s27 = sadd.s32 %s678_s23, %s1093_s22 }
  0x11   : > { %v757_v0 = vld [vmem:[%s262_s26 + $0x18] sm:$0xff]  ;;  %v756_v1 = vld [vmem:[%s262_s26 + $0x10] sm:$0xff]  ;;  %v755_v2 = vld [vmem:[%s262_s26 + $0x8] sm:$0xff]  ;;  %s267_s5 = scalar_lea.vmem %s1077_s2, %s683_s28  ;;  %s679_s6 = sshll.u32 %s995_s27, 2 }
  0x12   : > { %429 = vmatpush.bf16.msra.mxu0 %v757_v0  ;;  %844 = vmatpush.bf16.msra.mxu1 %v757_v0  ;;  %v754_v3 = vld [vmem:[%s262_s26] sm:$0xff]  ;;  %v748_v5 = vld [vmem:[%s267_s5 + $0x10] sm:$0xff]  ;;  %v747_v8 = vld [vmem:[%s267_s5 + $0x8] sm:$0xff]  ;;  %s1014_s9 = scalar_lea.vmem %s1075_s0, %s679_s6  ;;  %s1034_s14 = scalar_lea.vmem %s1079_s4, %s679_s6 }
  0x13   : > { %845 = vmatpush.bf16.msra.mxu2 %v757_v0  ;;  %846 = vmatpush.bf16.msra.mxu3 %v757_v0  ;;  %v746_v4 = vld [vmem:[%s267_s5] sm:$0xff]  ;;  %v752_v7 = vld [vmem:[%s267_s5 + $0x30] sm:$0xff]  ;;  %v749_v9 = vld [vmem:[%s267_s5 + $0x18] sm:$0xff] }
  0x14   : > { %v750_v6 = vld [vmem:[%s267_s5 + $0x20] sm:$0xff]  ;;  %v751_v10 = vld [vmem:[%s267_s5 + $0x28] sm:$0xff]  ;;  %v753_v11 = vld [vmem:[%s267_s5 + $0x38] sm:$0xff] }
  0x15   : > { %v759_v12 = vld [vmem:[%s1014_s9] sm:$0xff]   ;;  %v831_v13 = vld [vmem:[%s1014_s9 + $0x10] sm:$0xff]   ;;  %v830_v45 = vld [vmem:[%s1014_s9 + $0x8] sm:$0xff]  }
  0x16   : > { %430 = vmatpush.bf16.msra.mxu0 %v756_v1  ;;  %847 = vmatpush.bf16.msra.mxu1 %v756_v1  ;;  %v760_v16 = vunpack.c.l.bf16 %v759_v12  ;;  %v768_v17 = vunpack.c.l.bf16 %v831_v13  ;;  %v833_v21 = vld [vmem:[%s1014_s9 + $0x20] sm:$0xff]   ;;  %v835_v22 = vld [vmem:[%s1014_s9 + $0x30] sm:$0xff]   ;;  %v761_v23 = vunpack.c.h.bf16 %v759_v12  ;;  %v769_v24 = vunpack.c.h.bf16 %v831_v13  ;;  %v832_v46 = vld [vmem:[%s1014_s9 + $0x18] sm:$0xff]  }
  0x17   : > { %848 = vmatpush.bf16.msra.mxu2 %v756_v1  ;;  %849 = vmatpush.bf16.msra.mxu3 %v756_v1  ;;  %v776_v27 = vunpack.c.l.bf16 %v833_v21  ;;  %v784_v28 = vunpack.c.l.bf16 %v835_v22  ;;  %v777_v39 = vunpack.c.h.bf16 %v833_v21  ;;  %v785_v40 = vunpack.c.h.bf16 %v835_v22 }
  0x18   : > { %v764_v57 = vunpack.c.l.bf16 %v830_v45  ;;  %v772_v58 = vunpack.c.l.bf16 %v832_v46 }
  0x1a   : > { %431 = vmatpush.bf16.msra.mxu0 %v755_v2  ;;  %850 = vmatpush.bf16.msra.mxu1 %v755_v2 }
  0x1b   : > { %851 = vmatpush.bf16.msra.mxu2 %v755_v2  ;;  %852 = vmatpush.bf16.msra.mxu3 %v755_v2 }
  0x1e   : > { %432 = vmatpush.bf16.msra.mxu0 %v754_v3  ;;  %853 = vmatpush.bf16.msra.mxu1 %v754_v3 }
  0x1f   : > { %854 = vmatpush.bf16.msra.mxu2 %v754_v3  ;;  %855 = vmatpush.bf16.msra.mxu3 %v754_v3  ;;  %v834_v3 = vld [vmem:[%s1014_s9 + $0x28] sm:$0xff]  }
  0x21   : > { %735 = vmatmul.msk.bf16.vlgmr.msra.gmra.mxu0 %vm400_vm0, %v746_v4  ;;  %737 = vmatmul.msk.bf16.vlgmr.msra.gmra.mxu1 %vm400_vm0, %v748_v5  ;;  %v836_v4 = vld [vmem:[%s1014_s9 + $0x38] sm:$0xff]   ;;  %v765_v5 = vunpack.c.h.bf16 %v830_v45 }
  0x22   : > { %739 = vmatmul.msk.bf16.vlgmr.msra.gmra.mxu2 %vm400_vm0, %v750_v6  ;;  %741 = vmatmul.msk.bf16.vlgmr.msra.gmra.mxu3 %vm400_vm0, %v752_v7  ;;  %v773_v6 = vunpack.c.h.bf16 %v832_v46  ;;  %v788_v12 = vunpack.c.l.bf16 %v836_v4 }
  0x31   : > { %736 = vmatmul.msk.bf16.gmra.mxu0 %vm400_vm0, %v747_v8  ;;  %738 = vmatmul.msk.bf16.gmra.mxu1 %vm400_vm0, %v749_v9 }
  0x32   : > { %740 = vmatmul.msk.bf16.gmra.mxu2 %vm400_vm0, %v751_v10  ;;  %742 = vmatmul.msk.bf16.gmra.mxu3 %vm400_vm0, %v753_v11  ;;  %v780_v11 = vunpack.c.l.bf16 %v834_v3 }
  0x9e   : > { %v434_v14 = vpop.f32.mrf.mxu0  ;;  %v444_v15 = vpop.f32.mrf.mxu1 }
  0x9f   : > { %v474_v18 = vadd.f32 %v760_v16, %v434_v14  ;;  %v478_v20 = vadd.f32 %v768_v17, %v444_v15 }
  0xa1   : > { %v494_v31 = vadd.f32 %v1021_v19, %v474_v18  ;;  %v498_v32 = vadd.f32 %v1021_v19, %v478_v20 }
  0xa3   : > { %v510_v41 = vmax.f32 %v494_v31, 0.0  ;;  %v514_v42 = vmax.f32 %v498_v32, 0.0 }
  0xa5   : > { %v454_v25 = vpop.f32.mrf.mxu2  ;;  %v464_v26 = vpop.f32.mrf.mxu3 }
  0xa6   : > { %v436_v29 = vpop.f32.mrf.mxu0  ;;  %v446_v30 = vpop.f32.mrf.mxu1  ;;  %v482_v37 = vadd.f32 %v776_v27, %v454_v25  ;;  %v486_v38 = vadd.f32 %v784_v28, %v464_v26  ;;  %v789_v25 = vunpack.c.h.bf16 %v836_v4 }
  0xa7   : > { %v475_v33 = vadd.f32 %v761_v23, %v436_v29  ;;  %v479_v34 = vadd.f32 %v769_v24, %v446_v30  ;;  %v781_v24 = vunpack.c.h.bf16 %v834_v3 }
  0xa8   : > { %v502_v51 = vadd.f32 %v1021_v19, %v482_v37  ;;  %v506_v52 = vadd.f32 %v1021_v19, %v486_v38 }
  0xa9   : > { %v495_v35 = vadd.f32 %v1021_v19, %v475_v33  ;;  %v499_v36 = vadd.f32 %v1021_v19, %v479_v34 }
  0xaa   : > { %v518_v61 = vmax.f32 %v502_v51, 0.0  ;;  %v522_v62 = vmax.f32 %v506_v52, 0.0 }
  0xab   : > { %v511_v43 = vmax.f32 %v495_v35, 0.0  ;;  %v515_v44 = vmax.f32 %v499_v36, 0.0 }
  0xad   : > { %v793_v47 = vpack.c.bf16 %v511_v43, %v510_v41  ;;  %v803_v48 = vpack.c.bf16 %v515_v44, %v514_v42  ;;  %v456_v49 = vpop.f32.mrf.mxu2  ;;  %v466_v50 = vpop.f32.mrf.mxu3 }
  0xae   : > { %v483_v53 = vadd.f32 %v777_v39, %v456_v49  ;;  %v487_v54 = vadd.f32 %v785_v40, %v466_v50  ;;  %v439_v55 = vpop.f32.mrf.mxu0  ;;  %v449_v56 = vpop.f32.mrf.mxu1 }
  0xaf   : > { %794 = vst [vmem:[%s1034_s14] sm:$0xff] %v793_v47   ;;  %v476_v1 = vadd.f32 %v764_v57, %v439_v55  ;;  %v480_v2 = vadd.f32 %v772_v58, %v449_v56 }
  0xb0   : > { %838 = vst [vmem:[%s1034_s14 + $0x10] sm:$0xff] %v803_v48   ;;  %v503_v59 = vadd.f32 %v1021_v19, %v483_v53  ;;  %v507_v60 = vadd.f32 %v1021_v19, %v487_v54 }
  0xb1   : > { %v496_v15 = vadd.f32 %v1021_v19, %v476_v1  ;;  %v500_v16 = vadd.f32 %v1021_v19, %v480_v2 }
  0xb2   : > { %v519_v63 = vmax.f32 %v503_v59, 0.0  ;;  %v523_v0 = vmax.f32 %v507_v60, 0.0 }
  0xb3   : > { %v512_v26 = vmax.f32 %v496_v15, 0.0  ;;  %v516_v27 = vmax.f32 %v500_v16, 0.0 }
  0xb4   : > { %v813_v7 = vpack.c.bf16 %v519_v63, %v518_v61  ;;  %v823_v8 = vpack.c.bf16 %v523_v0, %v522_v62 }
  0xb5   : > { %v459_v9 = vpop.f32.mrf.mxu2  ;;  %v469_v10 = vpop.f32.mrf.mxu3 }
  0xb6   : > { %840 = vst [vmem:[%s1034_s14 + $0x20] sm:$0xff] %v813_v7   ;;  %v441_v13 = vpop.f32.mrf.mxu0  ;;  %v451_v14 = vpop.f32.mrf.mxu1  ;;  %v484_v22 = vadd.f32 %v780_v11, %v459_v9  ;;  %v488_v23 = vadd.f32 %v788_v12, %v469_v10 }
  0xb7   : > { %842 = vst [vmem:[%s1034_s14 + $0x30] sm:$0xff] %v823_v8   ;;  %v477_v17 = vadd.f32 %v765_v5, %v441_v13  ;;  %v481_v18 = vadd.f32 %v773_v6, %v451_v14 }
  0xb8   : > { %v504_v34 = vadd.f32 %v1021_v19, %v484_v22  ;;  %v508_v35 = vadd.f32 %v1021_v19, %v488_v23 }
  0xb9   : > { %v497_v20 = vadd.f32 %v1021_v19, %v477_v17  ;;  %v501_v21 = vadd.f32 %v1021_v19, %v481_v18 }
  0xba   : > { %v520_v40 = vmax.f32 %v504_v34, 0.0  ;;  %v524_v41 = vmax.f32 %v508_v35, 0.0 }
  0xbb   : > { %v513_v28 = vmax.f32 %v497_v20, 0.0  ;;  %v517_v29 = vmax.f32 %v501_v21, 0.0 }
  0xbd   : > { %v798_v30 = vpack.c.bf16 %v513_v28, %v512_v26  ;;  %v808_v31 = vpack.c.bf16 %v517_v29, %v516_v27  ;;  %v461_v32 = vpop.f32.mrf.mxu2  ;;  %v471_v33 = vpop.f32.mrf.mxu3 }
  0xbe   : > { %v485_v36 = vadd.f32 %v781_v24, %v461_v32  ;;  %v489_v37 = vadd.f32 %v789_v25, %v471_v33 }
  0xbf   : > { %837 = vst [vmem:[%s1034_s14 + $0x8] sm:$0xff] %v798_v30  }
  0xc0   : > { %839 = vst [vmem:[%s1034_s14 + $0x18] sm:$0xff] %v808_v31   ;;  %v505_v38 = vadd.f32 %v1021_v19, %v485_v36  ;;  %v509_v39 = vadd.f32 %v1021_v19, %v489_v37 }
  0xc2   : > { %v521_v42 = vmax.f32 %v505_v38, 0.0  ;;  %v525_v43 = vmax.f32 %v509_v39, 0.0 }
  0xc4   : > { %v818_v44 = vpack.c.bf16 %v521_v42, %v520_v40  ;;  %v828_v45 = vpack.c.bf16 %v525_v43, %v524_v41 }
  0xc6   : > { %841 = vst [vmem:[%s1034_s14 + $0x28] sm:$0xff] %v818_v44  }
  0xc7   : > { %843 = vst [vmem:[%s1034_s14 + $0x38] sm:$0xff] %v828_v45  }
  0xc8 PF: > { %s14_s19 = sadd.s32 1, %s935_s19   ;;  %s1080_s15 = smov %s927_s17 }
  0xc9   : > { %p11_p7 = scmp.ge.s32.totalorder %s14_s19, 6   ;;  %s1081_s16 = smov %s931_s18 }
  0xca   : > { %s1082_s17 = smov %s1085_s20  ;;  %s1083_s18 = smov %s1089_s21 }
  0xcb   :  { %13 = sbr.rel (!%p11_p7) target bundleno = 3 (0x3), region = 72 }

</bundles_post_ra>
